<compile_context>
chip_gen: v7x
topology: tpu7x:2x2x1
jax: 0.10.0
libtpu: 0.0.40
codegen_flags: <defaults>
</compile_context>

<pallas_src>
import jax
import jax.numpy as jnp
from jax.experimental import pallas as pl
from jax.experimental.pallas import tpu as pltpu

_LANE = 128                    # TPU lane width; last dim of the 2-D slab
_TARGET_BLOCK_BYTES = 2 << 20  # ~2 MiB per block -> ~8 MiB with in+out double buffers


def _copy_kernel(x_ref, o_ref):
    # Whole-tile copy: the identity "forward" of BaseModel.
    o_ref[...] = x_ref[...]


def _sublane_multiple(dtype):
    # Native packed sublane tiling: f32 -> 8 rows, bf16 -> 16, int8/fp8 -> 32.
    itemsize = jnp.dtype(dtype).itemsize
    return max(8, 32 // itemsize)


def _pallas_identity_2d(x2d):
    """Tiled identity copy of a rank-2 array, blocked along the leading dim."""
    rows, lanes = x2d.shape
    itemsize = jnp.dtype(x2d.dtype).itemsize
    sub = _sublane_multiple(x2d.dtype)

    # Largest sublane-packed row count whose block stays near the ~2 MiB target.
    block_rows = max(sub, (_TARGET_BLOCK_BYTES // (lanes * itemsize)) // sub * sub)
    if rows <= block_rows:
        # Single full-extent block (allowed even when rows % 8 != 0).
        block_rows = rows
    grid = (pl.cdiv(rows, block_rows),)   # Pallas masks the ragged edge block.
    blk = (block_rows, lanes)

    return pl.pallas_call(
        _copy_kernel,
        out_shape=jax.ShapeDtypeStruct((rows, lanes), x2d.dtype),
        grid_spec=pl.GridSpec(
            grid=grid,
            in_specs=[pl.BlockSpec(blk, lambda i: (i, 0))],
            out_specs=pl.BlockSpec(blk, lambda i: (i, 0)),
        ),
        # Output reuses the input HBM buffer (XLA inserts a defensive copy only
        # if the caller's buffer cannot actually be donated).
        input_output_aliases={0: 0},
        compiler_params=pltpu.CompilerParams(
            # Independent tiles: shards the grid across the 2 TensorCores on
            # v7x; a plain serial loop on v5e/v6e (1 TC).
            dimension_semantics=("parallel",),
        ),
        cost_estimate=pl.CostEstimate(
            flops=0,
            transcendentals=0,
            bytes_accessed=int(2 * rows * lanes * itemsize),
        ),
    )(x2d)


def base_model_forward(x, *, num_nodes, input_dim, output_dim,
                       seq_length=12, horizon=12, use_pallas=True):
    """Identity forward of BaseModel.

    x: [B, T, N, C] with T == seq_length, N == num_nodes, C == input_dim.
    With use_pallas=False the input is returned as-is (zero HBM traffic —
    the truly optimal identity).  With use_pallas=True the copy runs through
    a lane-dense tiled Pallas kernel.
    """
    B, T, N, C = x.shape
    assert T == seq_length and N == num_nodes and C == input_dim

    if not use_pallas:
        return x

    total = x.size
    if total % _LANE == 0:
        # Lane-dense slab: every store is a full-width unmasked vst.
        x2d = x.reshape(total // _LANE, _LANE)
    else:
        # Fallback: natural trailing dim (may use masked stores, but still a
        # single copy pass with no pad/slice round-trips).
        x2d = x.reshape(-1, C)

    out2d = _pallas_identity_2d(x2d)
    return out2d.reshape(x.shape)


def param_num():
    # BaseModel registers no nn.Parameters.
    return 0


if __name__ == "__main__":
    # Small deterministic shapes consistent with the module's __init__:
    #   num_nodes=8, input_dim=4, seq_length=12, horizon=12, batch=2
    B, T, N, C = 2, 12, 8, 4
    key = jax.random.PRNGKey(0)
    x = jax.random.normal(key, (B, T, N, C), dtype=jnp.float32)

    y = base_model_forward(
        x, num_nodes=N, input_dim=C, output_dim=C, seq_length=T, horizon=12
    )
    y = jax.block_until_ready(y)

    # Identity forward: output must equal input exactly (bit-exact copy).
    assert y.shape == x.shape and y.dtype == x.dtype
    assert bool(jnp.all(y == x))
    assert param_num() == 0

    print("KERNEL_OK")
</pallas_src>

<mosaic_0001>
module attributes {stable_mosaic.version = 11 : i64} {
  func.func @_copy_kernel(%arg0: i32, %arg1: memref<6x128xf32, #tpu.memory_space<vmem>>, %arg2: memref<6x128xf32, #tpu.memory_space<vmem>>) attributes {dimension_semantics = [#tpu.dimension_semantics<parallel>], iteration_bounds = array<i64: 1>, scalar_prefetch = 0 : i64, scratch_operands = 0 : i64, tpu.core_type = #tpu.core_type<tc>, window_params = [{transform_indices = @transform_0, window_bounds = array<i64: 6, 128>}, {transform_indices = @transform_1, window_bounds = array<i64: 6, 128>}]} {
    %c0 = arith.constant 0 : index
    %c0_0 = arith.constant 0 : index
    %0 = vector.load %arg1[%c0, %c0_0] : memref<6x128xf32, #tpu.memory_space<vmem>>, vector<6x128xf32>
    %c0_1 = arith.constant 0 : index
    %c0_2 = arith.constant 0 : index
    %1 = vector.load %arg2[%c0_1, %c0_2] : memref<6x128xf32, #tpu.memory_space<vmem>>, vector<6x128xf32>
    tpu.vector_store %arg2[%c0_1, %c0_2], %0 {strides = array<i32>} : memref<6x128xf32, #tpu.memory_space<vmem>>, vector<6x128xf32>,
    return
  }
  func.func @transform_0(%arg0: i32) -> (i32, i32) {
    %c0_i32 = arith.constant 0 : i32
    %c0_i32_0 = arith.constant 0 : i32
    return %arg0, %c0_i32 : i32, i32
  }
  func.func @transform_1(%arg0: i32) -> (i32, i32) {
    %c0_i32 = arith.constant 0 : i32
    %c0_i32_0 = arith.constant 0 : i32
    return %arg0, %c0_i32 : i32, i32
  }
}

</mosaic_0001>

<bundles_post_ra>
// kernel: tpu_custom_call.1
= control target key start
LH: loop header
LB: loop body
LE: loop exit
PB: predicated region body
PF: predicated region fallthrough
CT: control target
= control target key end

     0   :  { %6 = vsyncpa [#allocation3], 0  ;;  %s124_s0 = inlined_call_operand.hbm [shape: f32[6,128], index: 0, kind: input, shape index: {}, may-alias: {0,1}]   ;;  %s125_s1 = inlined_call_operand.hbm [shape: f32[6,128], index: 1, kind: output, shape index: {}, may-alias: {0,1}]  }
   0x1   :  { %7 = vsyncpa [#allocation4], 0  ;;  %s88_s6 = smov [#allocation2]   ;;  %s40_s10 = scalar_lea.hbm %s124_s0, 128 }
   0x2   :  { %s14_s7 = sshll.u32 %s88_s6, 4  ;;  %p41_p0 = scmp.ne.s32.totalorder %s124_s0, %s40_s10  ;;  %s15_s7 = int_to_ptr.vmem [resolvable:$true] %s14_s7 }
   0x3   :  { %p44_p1 = scmp.lt.u32.totalorder %s40_s10, %s124_s0 }
   0x5   :  { %p46_p2 = pnand %p44_p1, %p41_p0 }
   0x7   :  { %49 = shalt.err (!%p46_p2)
}
   0x8   :  { %s50_s15 = scalar_lea.vmem %s15_s7, 128  ;;  %p55_p4 = scmp.lt.s32.totalorder %s15_s7, %s15_s7 }
   0x9   :  { %p51_p3 = scmp.ne.s32.totalorder %s15_s7, %s50_s15  ;;  %p56_p5 = scmp.lt.s32.totalorder %s50_s15, %s50_s15 }
   0xb   :  { %p57_p6 = por %p56_p5, %p55_p4 }
   0xd   :  { %p58_p7 = pnand %p57_p6, %p51_p3 }
   0xf   :  { %61 = shalt.err (!%p58_p7)
}
  0x10   :  { %17 = dma.hbm_to_vmem [thread:$0]  %s124_s0, 128, %s15_s7, [#allocation3]  }
  0x11   :  { %84 = dma.done.wait [#allocation3], 128  }
  0x12   :  { %85 = vsyncadd [#allocation3], 4294967168  ;;  %s89_s18 = smov [#allocation5]   ;;  %v21_v0 = vld [vmem:[#allocation2] sm:$0x3f] }
  0x13   :  { %s29_s19 = sshll.u32 %s89_s18, 4  ;;  %22 = vst [vmem:[#allocation5] sm:$0x3f] %v21_v0  ;;  %s30_s19 = int_to_ptr.vmem [resolvable:$true] %s29_s19 }
  0x14   :  { %s62_s20 = scalar_lea.vmem %s30_s19, 128  ;;  %p67_p9 = scmp.lt.s32.totalorder %s30_s19, %s30_s19 }
  0x15   :  { %p63_p8 = scmp.ne.s32.totalorder %s30_s19, %s62_s20  ;;  %p68_p10 = scmp.lt.s32.totalorder %s62_s20, %s62_s20 }
  0x17   :  { %p69_p11 = por %p68_p10, %p67_p9 }
  0x19   :  { %p70_p12 = pnand %p69_p11, %p63_p8 }
  0x1b   :  { %73 = shalt.err (!%p70_p12)
}
  0x1c   :  { %s74_s23 = scalar_lea.hbm %s125_s1, 128 }
  0x1d   :  { %p75_p13 = scmp.ne.s32.totalorder %s125_s1, %s74_s23  ;;  %p78_p0 = scmp.lt.u32.totalorder %s74_s23, %s125_s1 }
  0x1f   :  { %p80_p1 = pnand %p78_p0, %p75_p13 }
  0x21   :  { %83 = shalt.err (!%p80_p1)
}
  0x22   :  { %32 = dma.vmem_to_hbm [thread:$0]  %s30_s19, 128, %s125_s1, [#allocation4]  }
  0x23   :  { %86 = dma.done.wait [#allocation4], 128  }
  0x24   :  { %87 = vsyncadd [#allocation4], 4294967168 }
  0x25   :  { %36 = vsyncpa [#allocation3], 1 }
  0x26   :  { %37 = vsyncpa [#allocation4], 1 }

</bundles_post_ra>
